<compile_context>
chip_gen: v6e
topology: v6e:2x2x1
jax: 0.10.0
libtpu: 0.0.40
codegen_flags: <defaults>
</compile_context>

<pallas_src>
import functools

import jax
import jax.numpy as jnp
from jax.experimental import pallas as pl
from jax.experimental.pallas import tpu as pltpu


def _gcnn_kernel(xp_ref, wa_ref, wg_ref, ba_ref, bg_ref, out_ref, *,
                 seq_len, residual):
    """One batch element per grid step.

    xp_ref : (S+2, E)  padded input rows for this batch (compute dtype)
    wa_ref : (3, E, E) per-tap weights, A half          (compute dtype)
    wg_ref : (3, E, E) per-tap weights, gate half       (compute dtype)
    ba_ref : (S, E)    conv bias + positional bias, A half   (f32)
    bg_ref : (S, E)    conv bias + positional bias, gate half (f32)
    out_ref: (S, E)
    """
    S = seq_len
    xp = xp_ref[...]                      # single VMEM load, then static slices
    x0 = xp[0:S, :]                       # x_{t-1}
    x1 = xp[1:S + 1, :]                   # x_t
    x2 = xp[2:S + 2, :]                   # x_{t+1}

    # 3-tap conv == three (S, E) @ (E, E) MXU dots per gate, f32 accumulation.
    h_a = jnp.dot(x0, wa_ref[0], preferred_element_type=jnp.float32)
    h_a += jnp.dot(x1, wa_ref[1], preferred_element_type=jnp.float32)
    h_a += jnp.dot(x2, wa_ref[2], preferred_element_type=jnp.float32)
    h_a += ba_ref[...]

    h_g = jnp.dot(x0, wg_ref[0], preferred_element_type=jnp.float32)
    h_g += jnp.dot(x1, wg_ref[1], preferred_element_type=jnp.float32)
    h_g += jnp.dot(x2, wg_ref[2], preferred_element_type=jnp.float32)
    h_g += bg_ref[...]

    out = h_a * jax.nn.sigmoid(h_g)       # GLU gating in f32 (EUP + VPU)
    if residual:                          # fused residual: no extra HBM pass
        out = out + x1.astype(jnp.float32)
    out_ref[...] = out.astype(out_ref.dtype)


def gcnn_forward(x, conv_w, conv_b, b_param, *, residual=False, mxu_dtype=None):
    """x: (B, S, E); conv_w: (2E, 1, 3, E); conv_b: (2E,); b_param: (1, 2E, S, 1)."""
    B, S, E = x.shape
    C = 2 * E
    assert conv_w.shape == (C, 1, 3, E)
    assert conv_b.shape == (C,)
    assert b_param.shape == (1, C, S, 1)

    out_dtype = x.dtype
    compute_dtype = mxu_dtype if mxu_dtype is not None else x.dtype

    # Pad sequence dim once (Conv2d padding=(1, 0)); no 3x im2col copy.
    xp = jnp.pad(x, ((0, 0), (1, 1), (0, 0))).astype(compute_dtype)   # (B, S+2, E)

    # conv weight (C, 1, 3, E) -> per-tap (E, C) matmul weights, split A / gate.
    w_taps = jnp.transpose(conv_w[:, 0, :, :], (1, 2, 0))             # (3, E, C)
    w_a = w_taps[:, :, :E].astype(compute_dtype)                      # (3, E, E)
    w_g = w_taps[:, :, E:].astype(compute_dtype)                      # (3, E, E)

    # Channel + positional bias: (S, C) = conv_b + b_param[0, :, :, 0].T, split.
    bias = (conv_b[None, :] + jnp.transpose(b_param[0, :, :, 0])).astype(jnp.float32)
    bias_a = bias[:, :E]                                              # (S, E)
    bias_g = bias[:, E:]                                              # (S, E)

    kernel = functools.partial(_gcnn_kernel, seq_len=S, residual=residual)

    out = pl.pallas_call(
        kernel,
        out_shape=jax.ShapeDtypeStruct((B, S, E), out_dtype),
        grid=(B,),
        in_specs=[
            pl.BlockSpec((None, S + 2, E), lambda b: (b, 0, 0)),   # per-batch x tile
            pl.BlockSpec((3, E, E), lambda b: (0, 0, 0)),          # resident weights (A)
            pl.BlockSpec((3, E, E), lambda b: (0, 0, 0)),          # resident weights (gate)
            pl.BlockSpec((S, E), lambda b: (0, 0)),                # resident bias (A)
            pl.BlockSpec((S, E), lambda b: (0, 0)),                # resident bias (gate)
        ],
        out_specs=pl.BlockSpec((None, S, E), lambda b: (b, 0, 0)),
        compiler_params=pltpu.CompilerParams(
            dimension_semantics=("parallel",),      # batch axis -> megacore / 2 TCs
            vmem_limit_bytes=32 * 1024 * 1024,
        ),
    )(xp, w_a, w_g, bias_a, bias_g)

    return out


def _reference(x, conv_w, conv_b, b_param, residual=False):
    """Pure-JAX reference mirroring the PyTorch forward."""
    B, S, E = x.shape
    xp = jnp.pad(x, ((0, 0), (1, 1), (0, 0)))
    windows = jnp.stack([xp[:, k:k + S, :] for k in range(3)], axis=2)   # (B, S, 3, E)
    h = jnp.einsum("bske,cke->bsc", windows, conv_w[:, 0])               # (B, S, 2E)
    h = h + conv_b[None, None, :] + jnp.transpose(b_param[0, :, :, 0])[None]
    a = h[..., :E]
    g = h[..., E:]
    out = a * jax.nn.sigmoid(g)
    if residual:
        out = x + out
    return out


if __name__ == "__main__":
    batch, seq_len, emb_dim = 2, 8, 32
    key = jax.random.PRNGKey(0)
    k_x, k_w, k_cb, k_b = jax.random.split(key, 4)

    x = jax.random.normal(k_x, (batch, seq_len, emb_dim), dtype=jnp.float32)
    conv_w = jax.random.normal(k_w, (2 * emb_dim, 1, 3, emb_dim), dtype=jnp.float32) * 0.1
    conv_b = jax.random.normal(k_cb, (2 * emb_dim,), dtype=jnp.float32) * 0.1
    b_param = jax.random.uniform(
        k_b, (1, 2 * emb_dim, seq_len, 1), dtype=jnp.float32, minval=-0.2, maxval=0.2
    )

    # f32 path: residual=False (module default) and residual=True (fused in-kernel).
    for residual in (False, True):
        out = jax.block_until_ready(
            gcnn_forward(x, conv_w, conv_b, b_param, residual=residual))
        ref = _reference(x, conv_w, conv_b, b_param, residual=residual)
        assert out.shape == (batch, seq_len, emb_dim)
        assert jnp.allclose(out, ref, atol=1e-5, rtol=1e-5), f"mismatch residual={residual}"

    # bf16 MXU path (recommended on v5e/v6e/v7x): bf16 DMA + matmul, f32 epilogue.
    out_bf16 = jax.block_until_ready(
        gcnn_forward(x, conv_w, conv_b, b_param, residual=False, mxu_dtype=jnp.bfloat16))
    ref = _reference(x, conv_w, conv_b, b_param, residual=False)
    assert jnp.allclose(out_bf16, ref, atol=5e-2, rtol=5e-2), "bf16 mismatch"

    print("KERNEL_OK")
</pallas_src>

<mosaic_0001>
module attributes {stable_mosaic.version = 11 : i64} {
  func.func @_gcnn_kernel(%arg0: i32, %arg1: memref<1x10x32xf32, #tpu.memory_space<vmem>>, %arg2: memref<3x32x32xf32, #tpu.memory_space<vmem>>, %arg3: memref<3x32x32xf32, #tpu.memory_space<vmem>>, %arg4: memref<8x32xf32, #tpu.memory_space<vmem>>, %arg5: memref<8x32xf32, #tpu.memory_space<vmem>>, %arg6: memref<1x8x32xf32, #tpu.memory_space<vmem>>) attributes {dimension_semantics = [#tpu.dimension_semantics<parallel>], iteration_bounds = array<i64: 2>, scalar_prefetch = 0 : i64, scratch_operands = 0 : i64, tpu.core_type = #tpu.core_type<tc>, window_params = [{transform_indices = @transform_0, window_bounds = array<i64: 1, 10, 32>}, {pipeline_mode = #tpu.pipeline_mode<synchronous>, transform_indices = @transform_1, window_bounds = array<i64: 3, 32, 32>}, {pipeline_mode = #tpu.pipeline_mode<synchronous>, transform_indices = @transform_2, window_bounds = array<i64: 3, 32, 32>}, {pipeline_mode = #tpu.pipeline_mode<synchronous>, transform_indices = @transform_3, window_bounds = array<i64: 8, 32>}, {pipeline_mode = #tpu.pipeline_mode<synchronous>, transform_indices = @transform_4, window_bounds = array<i64: 8, 32>}, {transform_indices = @transform_5, window_bounds = array<i64: 1, 8, 32>}]} {
    %c0 = arith.constant 0 : index
    %c0_0 = arith.constant 0 : index
    %c0_1 = arith.constant 0 : index
    %0 = vector.load %arg1[%c0, %c0_0, %c0_1] : memref<1x10x32xf32, #tpu.memory_space<vmem>>, vector<1x10x32xf32>
    %1 = vector.shape_cast %0 : vector<1x10x32xf32> to vector<10x32xf32>
    %2 = vector.extract_strided_slice %1 {offsets = [0, 0], sizes = [8, 32], strides = [1, 1]} : vector<10x32xf32> to vector<8x32xf32>
    %3 = vector.extract_strided_slice %1 {offsets = [1, 0], sizes = [8, 32], strides = [1, 1]} : vector<10x32xf32> to vector<8x32xf32>
    %4 = vector.extract_strided_slice %1 {offsets = [2, 0], sizes = [8, 32], strides = [1, 1]} : vector<10x32xf32> to vector<8x32xf32>
    %c0_2 = arith.constant 0 : index
    %c0_3 = arith.constant 0 : index
    %c0_4 = arith.constant 0 : index
    %5 = vector.load %arg2[%c0_2, %c0_3, %c0_4] : memref<3x32x32xf32, #tpu.memory_space<vmem>>, vector<1x32x32xf32>
    %6 = vector.shape_cast %5 : vector<1x32x32xf32> to vector<32x32xf32>
    %cst = arith.constant dense<0.000000e+00> : vector<8x32xf32>
    %7 = tpu.matmul %2, %6, %cst {dimension_numbers = #tpu.dot_dimension_numbers<[1], [0], [0], [1], [0, 0, 1, 1], [], []>} : vector<8x32xf32>, vector<32x32xf32>, vector<8x32xf32> -> vector<8x32xf32>
    %c1 = arith.constant 1 : index
    %c0_5 = arith.constant 0 : index
    %c0_6 = arith.constant 0 : index
    %8 = vector.load %arg2[%c1, %c0_5, %c0_6] : memref<3x32x32xf32, #tpu.memory_space<vmem>>, vector<1x32x32xf32>
    %9 = vector.shape_cast %8 : vector<1x32x32xf32> to vector<32x32xf32>
    %cst_7 = arith.constant dense<0.000000e+00> : vector<8x32xf32>
    %10 = tpu.matmul %3, %9, %cst_7 {dimension_numbers = #tpu.dot_dimension_numbers<[1], [0], [0], [1], [0, 0, 1, 1], [], []>} : vector<8x32xf32>, vector<32x32xf32>, vector<8x32xf32> -> vector<8x32xf32>
    %11 = arith.addf %7, %10 : vector<8x32xf32>
    %c2 = arith.constant 2 : index
    %c0_8 = arith.constant 0 : index
    %c0_9 = arith.constant 0 : index
    %12 = vector.load %arg2[%c2, %c0_8, %c0_9] : memref<3x32x32xf32, #tpu.memory_space<vmem>>, vector<1x32x32xf32>
    %13 = vector.shape_cast %12 : vector<1x32x32xf32> to vector<32x32xf32>
    %cst_10 = arith.constant dense<0.000000e+00> : vector<8x32xf32>
    %14 = tpu.matmul %4, %13, %cst_10 {dimension_numbers = #tpu.dot_dimension_numbers<[1], [0], [0], [1], [0, 0, 1, 1], [], []>} : vector<8x32xf32>, vector<32x32xf32>, vector<8x32xf32> -> vector<8x32xf32>
    %15 = arith.addf %11, %14 : vector<8x32xf32>
    %c0_11 = arith.constant 0 : index
    %c0_12 = arith.constant 0 : index
    %16 = vector.load %arg4[%c0_11, %c0_12] : memref<8x32xf32, #tpu.memory_space<vmem>>, vector<8x32xf32>
    %17 = arith.addf %15, %16 : vector<8x32xf32>
    %c0_13 = arith.constant 0 : index
    %c0_14 = arith.constant 0 : index
    %c0_15 = arith.constant 0 : index
    %18 = vector.load %arg3[%c0_13, %c0_14, %c0_15] : memref<3x32x32xf32, #tpu.memory_space<vmem>>, vector<1x32x32xf32>
    %19 = vector.shape_cast %18 : vector<1x32x32xf32> to vector<32x32xf32>
    %cst_16 = arith.constant dense<0.000000e+00> : vector<8x32xf32>
    %20 = tpu.matmul %2, %19, %cst_16 {dimension_numbers = #tpu.dot_dimension_numbers<[1], [0], [0], [1], [0, 0, 1, 1], [], []>} : vector<8x32xf32>, vector<32x32xf32>, vector<8x32xf32> -> vector<8x32xf32>
    %c1_17 = arith.constant 1 : index
    %c0_18 = arith.constant 0 : index
    %c0_19 = arith.constant 0 : index
    %21 = vector.load %arg3[%c1_17, %c0_18, %c0_19] : memref<3x32x32xf32, #tpu.memory_space<vmem>>, vector<1x32x32xf32>
    %22 = vector.shape_cast %21 : vector<1x32x32xf32> to vector<32x32xf32>
    %cst_20 = arith.constant dense<0.000000e+00> : vector<8x32xf32>
    %23 = tpu.matmul %3, %22, %cst_20 {dimension_numbers = #tpu.dot_dimension_numbers<[1], [0], [0], [1], [0, 0, 1, 1], [], []>} : vector<8x32xf32>, vector<32x32xf32>, vector<8x32xf32> -> vector<8x32xf32>
    %24 = arith.addf %20, %23 : vector<8x32xf32>
    %c2_21 = arith.constant 2 : index
    %c0_22 = arith.constant 0 : index
    %c0_23 = arith.constant 0 : index
    %25 = vector.load %arg3[%c2_21, %c0_22, %c0_23] : memref<3x32x32xf32, #tpu.memory_space<vmem>>, vector<1x32x32xf32>
    %26 = vector.shape_cast %25 : vector<1x32x32xf32> to vector<32x32xf32>
    %cst_24 = arith.constant dense<0.000000e+00> : vector<8x32xf32>
    %27 = tpu.matmul %4, %26, %cst_24 {dimension_numbers = #tpu.dot_dimension_numbers<[1], [0], [0], [1], [0, 0, 1, 1], [], []>} : vector<8x32xf32>, vector<32x32xf32>, vector<8x32xf32> -> vector<8x32xf32>
    %28 = arith.addf %24, %27 : vector<8x32xf32>
    %c0_25 = arith.constant 0 : index
    %c0_26 = arith.constant 0 : index
    %29 = vector.load %arg5[%c0_25, %c0_26] : memref<8x32xf32, #tpu.memory_space<vmem>>, vector<8x32xf32>
    %30 = arith.addf %28, %29 : vector<8x32xf32>
    %31 = arith.negf %30 : vector<8x32xf32>
    %32 = math.exp %31 : vector<8x32xf32>
    %cst_27 = arith.constant 1.000000e+00 : f32
    %33 = vector.broadcast %cst_27 : f32 to vector<8x32xf32>
    %34 = arith.addf %33, %32 : vector<8x32xf32>
    %35 = arith.divf %33, %34 : vector<8x32xf32>
    %36 = arith.mulf %17, %35 : vector<8x32xf32>
    %c0_28 = arith.constant 0 : index
    %c0_29 = arith.constant 0 : index
    %c0_30 = arith.constant 0 : index
    %37 = vector.load %arg6[%c0_28, %c0_29, %c0_30] : memref<1x8x32xf32, #tpu.memory_space<vmem>>, vector<1x8x32xf32>
    %38 = vector.shape_cast %37 : vector<1x8x32xf32> to vector<8x32xf32>
    %39 = vector.shape_cast %36 : vector<8x32xf32> to vector<1x8x32xf32>
    tpu.vector_store %arg6[%c0_28, %c0_29, %c0_30], %39 {strides = array<i32>} : memref<1x8x32xf32, #tpu.memory_space<vmem>>, vector<1x8x32xf32>,
    return
  }
  func.func @transform_0(%arg0: i32) -> (i32, i32, i32) {
    %c0_i32 = arith.constant 0 : i32
    %c0_i32_0 = arith.constant 0 : i32
    %c0_i32_1 = arith.constant 0 : i32
    return %arg0, %c0_i32, %c0_i32_0 : i32, i32, i32
  }
  func.func @transform_1(%arg0: i32) -> (i32, i32, i32) {
    %c0_i32 = arith.constant 0 : i32
    %c0_i32_0 = arith.constant 0 : i32
    %c0_i32_1 = arith.constant 0 : i32
    %c0_i32_2 = arith.constant 0 : i32
    return %c0_i32, %c0_i32_0, %c0_i32_1 : i32, i32, i32
  }
  func.func @transform_2(%arg0: i32) -> (i32, i32, i32) {
    %c0_i32 = arith.constant 0 : i32
    %c0_i32_0 = arith.constant 0 : i32
    %c0_i32_1 = arith.constant 0 : i32
    %c0_i32_2 = arith.constant 0 : i32
    return %c0_i32, %c0_i32_0, %c0_i32_1 : i32, i32, i32
  }
  func.func @transform_3(%arg0: i32) -> (i32, i32) {
    %c0_i32 = arith.constant 0 : i32
    %c0_i32_0 = arith.constant 0 : i32
    %c0_i32_1 = arith.constant 0 : i32
    return %c0_i32, %c0_i32_0 : i32, i32
  }
  func.func @transform_4(%arg0: i32) -> (i32, i32) {
    %c0_i32 = arith.constant 0 : i32
    %c0_i32_0 = arith.constant 0 : i32
    %c0_i32_1 = arith.constant 0 : i32
    return %c0_i32, %c0_i32_0 : i32, i32
  }
  func.func @transform_5(%arg0: i32) -> (i32, i32, i32) {
    %c0_i32 = arith.constant 0 : i32
    %c0_i32_0 = arith.constant 0 : i32
    %c0_i32_1 = arith.constant 0 : i32
    return %arg0, %c0_i32, %c0_i32_0 : i32, i32, i32
  }
}

</mosaic_0001>

<bundles_post_ra>
// kernel: tpu_custom_call.1
= control target key start
LH: loop header
LB: loop body
LE: loop exit
PB: predicated region body
PF: predicated region fallthrough
CT: control target
= control target key end

     0   :  { %10 = vsyncpa [#allocation3], 0  ;;  %s1358_s0 = inlined_call_operand.vmem [shape: f32[2,10,32], index: 0, kind: input, shape index: {}]   ;;  %s1359_s1 = inlined_call_operand.hbm [shape: f32[3,32,32], index: 1, kind: input, shape index: {}]   ;;  %s1360_s2 = inlined_call_operand.hbm [shape: f32[3,32,32], index: 2, kind: input, shape index: {}]   ;;  %s1361_s3 = inlined_call_operand.vmem [shape: f32[8,32], index: 3, kind: input, shape index: {}]   ;;  %s1362_s4 = inlined_call_operand.vmem [shape: f32[8,32], index: 4, kind: input, shape index: {}]   ;;  %s1363_s5 = inlined_call_operand.hbm [shape: f32[2,8,32], index: 5, kind: output, shape index: {}]  }
   0x1   :  { %11 = vsyncpa [#allocation6], 0 }
   0x2   :  { %12 = vsyncpa [#allocation4], 0 }
   0x3   :  { %14 = vsyncpa [#allocation4 + $0x1], 0  ;;  %s1175_s18 = smov 0   ;;  %s1177_s19 = smov 0  }
   0x4   :  { %s1179_s20 = smov 0   ;;  %s1181_s21 = smov 0  }
   0x5 LB: > { %s1196_s22 = sadd.s32 4294967295, %s1136_s21   ;;  %s829_s23 = sadd.s32 4294967294, %s1136_s21   ;;  %s1136_s21 = sphi %s1181_s21, %s1377_s21   ;;  %s1132_s20 = sphi %s1179_s20, %s1376_s20   ;;  %s1128_s19 = sphi %s1177_s19, %s1375_s19   ;;  %s1124_s18 = sphi %s1175_s18, %s1374_s18  }
   0x6   : > { %s1200_s24 = sadd.s32 1, %s1136_s21   ;;  %s137_s25 = sadd.s32 1, %s1132_s20 }
   0x7   : > { %s134_s26 = ssub.s32 %s1136_s21, %s1200_s24  ;;  %p147_p0 = scmp.ne.s32.totalorder %s1132_s20, %s1128_s19 }
   0x8   : > { %p135_p1 = scmp.eq.s32.totalorder %s134_s26, 0  ;;  %p148_p2 = scmp.eq.s32.totalorder %s1196_s22, 1 }
   0x9   : > { %p153_p3 = scmp.ne.s32.totalorder %s1128_s19, %s1124_s18  ;;  %p154_p4 = scmp.eq.s32.totalorder %s829_s23, 1 }
   0xa   : > { %s1211_s27 = scalar_select %p135_p1, %s1132_s20, %s137_s25  }
   0xb   : > { %p1213_p5 = por %p148_p2, %p147_p0  ;;  %p1217_p6 = por %p154_p4, %p153_p3 }
   0xc   : > { %p830_p7 = scmp.ge.s32.totalorder %s1136_s21, 1  ;;  %p161_p8 = scmp.lt.s32.totalorder %s1136_s21, 3 }
   0xd   : > { %s1366_s29 = scalar_select %p1217_p6, 1, 0 }
   0xe   : > { %p1364_p9 = scmp.eq.s32.totalorder %s1196_s22, 0  ;;  %p1224_p10 = pnand %p830_p7, %p161_p8 }
   0xf   : > { %s1138_s6 = smov [#allocation2]   ;;  %s1139_s9 = smov [#allocation5]  }
  0x10   : > { %s173_s7 = sshll.u32 %s1138_s6, 4  ;;  %p958_p11 = pneg %p1224_p10  ;;  %s174_s7 = int_to_ptr.vmem [resolvable:$true] %s173_s7 }
  0x11   : > { %s186_s10 = sshll.u32 %s1139_s9, 4  ;;  %s1027_s11 = scalar_lea.vmem %s174_s7, 1536  ;;  %s187_s10 = int_to_ptr.vmem [resolvable:$true] %s186_s10 }
  0x12   : > { %p1232_p12 = pnand %p1364_p9, %p958_p11  ;;  %p1028_p0 = scmp.ne.s32.totalorder %s174_s7, %s1027_s11 }
  0x13   : > { %p1035_p3 = scmp.lt.s32.totalorder %s174_s7, %s174_s7  ;;  %p1036_p4 = scmp.lt.s32.totalorder %s1027_s11, %s1027_s11 }
  0x14   : > { %p1018_p13 = pneg %p1232_p12 }
  0x15   : > { %p1037_p7 = por %p1036_p4, %p1035_p3 }
  0x16   : > { %p1030_p1 = pnand %p1028_p0, %p1018_p13 }
  0x18   : > { %p1031_p2 = pneg %p1030_p1 }
  0x1a   : > { %p1038_p8 = pnand %p1037_p7, %p1031_p2 }
  0x1c   : > { %1041 = shalt.err (!%p1038_p8)
}
  0x1d   : > { %s1140_s12 = smov 128   ;;  %s1141_s13 = smov 8  }
  0x1e   : > { %961 = dma.hbm_to_vmem [thread:$0]  (!%p1232_p12), %s1359_s1, 1536, %s174_s7, [#allocation3], %s1140_s12, %s1140_s12, %s1141_s13  }
  0x1f   : > { %s1053_s16 = scalar_lea.vmem %s187_s10, 1536  ;;  %p1061_p9 = scmp.lt.s32.totalorder %s187_s10, %s187_s10 }
  0x20   : > { %p1054_p11 = scmp.ne.s32.totalorder %s187_s10, %s1053_s16  ;;  %p1062_p6 = scmp.lt.s32.totalorder %s1053_s16, %s1053_s16 }
  0x22   : > { %p1056_p0 = pnand %p1054_p11, %p1018_p13  ;;  %p1063_p3 = por %p1062_p6, %p1061_p9 }
  0x24   : > { %p1057_p1 = pneg %p1056_p0 }
  0x26   : > { %p1064_p2 = pnand %p1063_p3, %p1057_p1 }
  0x28   : > { %1067 = shalt.err (!%p1064_p2)
}
  0x29   : > { %964 = dma.hbm_to_vmem [thread:$0]  (!%p1232_p12), %s1360_s2, 1536, %s187_s10, [#allocation6], %s1140_s12, %s1140_s12, %s1141_s13  }
  0x2a   : > { %216 = sbr.rel (%p1224_p10) target bundleno = 327 (0x147), region = 40  ;;  %p1369_p4 = scmp.eq.s32.totalorder (!%p1224_p10), %s1196_s22, 0 }
  0x2f   : > { %1111 = dma.done.wait (%p1369_p4), [#allocation3], 1536   ;;  %p1370_p13 = pmov %p1369_p4 }
  0x30   : > { %p1371_p7 = pmov %p1369_p4 }
  0x31   : > { %1113 = vsyncadd (%p1370_p13), [#allocation3], 4294965760 }
  0x32   : > { %1115 = dma.done.wait (%p1371_p7), [#allocation6], 1536   ;;  %p1372_p6 = pmov %p1369_p4 }
  0x33   : > { %p248_p9 = scmp.lt.s32.totalorder %s1196_s22, 1  ;;  %v1142_v0 = vmov 0.0   ;;  %vm1143_vm0 = vmmov 0   ;;  %v263_v1 = vld [vmem:[#allocation2 + $0x38] sm:$0xff]  ;;  %v262_v3 = vld [vmem:[#allocation2 + $0x30] sm:$0xff]  ;;  %v261_v5 = vld [vmem:[#allocation2 + $0x28] sm:$0xff] }
  0x34   : > { %1117 = vsyncadd (%p1372_p6), [#allocation6], 4294965760  ;;  %882 = vmatprep.subr.mxu0 %v1142_v0  ;;  %893 = vmatprep.subr.mxu1 %v1142_v0  ;;  %v258_v2 = vld [vmem:[#allocation2 + $0x18] sm:$0xff]  ;;  %v257_v4 = vld [vmem:[#allocation2 + $0x10] sm:$0xff]  ;;  %vm266_vm1 = vcmask 1046528   ;;  %vm270_vm2 = vcmask 261120  }
  0x35   : > { %890 = vmatprep.mubr.msk.f32.mxu0 %vm1143_vm0, %v1142_v0  ;;  %s249_s25 = scalar_select %p248_p9, %s1196_s22, 1  ;;  %901 = vmatprep.mubr.msk.f32.mxu1 %vm1143_vm0, %v1142_v0  ;;  %v256_v6 = vld [vmem:[#allocation2 + $0x8] sm:$0xff]  ;;  %v260_v10 = vld [vmem:[#allocation2 + $0x20] sm:$0xff]  ;;  %v419_v14 = vld [vmem:[#allocation2 + $0x58] sm:$0xff]  ;;  %vm420_vm3 = vcmask 1045504  }
  0x36   : > { %883 = vmatpush3.msra.mxu0 %v263_v1  ;;  %894 = vmatpush3.msra.mxu1 %v258_v2  ;;  %v255_v11 = vld [vmem:[#allocation2] sm:$0xff]  ;;  %v507_v15 = vld [vmem:[#allocation5 + $0x38] sm:$0xff]  ;;  %v418_v16 = vld [vmem:[#allocation2 + $0x50] sm:$0xff]  ;;  %s245_s10 = sand.u32 1, %s1128_s19   ;;  %s848_s14 = sshll.u32 %s1196_s22, 7 }
  0x37   : > { %s851_s26 = sshll.u32 %s249_s25, 4  ;;  %884 = vmatprep.subr.mxu0 %v1142_v0  ;;  %895 = vmatprep.subr.mxu1 %v1142_v0  ;;  %v506_v17 = vld [vmem:[#allocation5 + $0x30] sm:$0xff]  ;;  %v417_v20 = vld [vmem:[#allocation2 + $0x48] sm:$0xff]  ;;  %v416_v22 = vld [vmem:[#allocation2 + $0x40] sm:$0xff]  ;;  %s837_s11 = sshll.u32 %s245_s10, 3 }
  0x38   : > { %s252_s7 = scalar_lea.vmem %s1358_s0, %s851_s26  ;;  %885 = vmatpush3.msra.mxu0 %v262_v3  ;;  %896 = vmatpush3.msra.mxu1 %v257_v4  ;;  %v505_v21 = vld [vmem:[#allocation5 + $0x28] sm:$0xff]  ;;  %v504_v23 = vld [vmem:[#allocation5 + $0x20] sm:$0xff]  ;;  %v502_v25 = vld [vmem:[#allocation5 + $0x18] sm:$0xff]  ;;  %s247_s15 = scalar_lea.vmem [#allocation7], %s837_s11 }
  0x39   : > { %v1277_v7 = vld [vmem:[%s252_s7] sm:$0xff]  ;;  %v254_v8 = vld [vmem:[%s252_s7 + $0x8] sm:$0x3]  ;;  %886 = vmatprep.subr.mxu0 %v1142_v0  ;;  %897 = vmatprep.subr.mxu1 %v1142_v0  ;;  %v652_v26 = vld [vmem:[#allocation5 + $0x58] sm:$0xff]  ;;  %s748_s16 = sshll.u32 %s247_s15, 4  ;;  %s746_s25 = scalar_lea.hbm %s1363_s5, %s848_s14  ;;  %s749_s16 = int_to_ptr.vmem [resolvable:$true] %s748_s16 }
  0x3a   : > { %v267_v9 = vrot.slane %v1277_v7, 1  ;;  %v268_v12 = vrot.slane %v254_v8, 1  ;;  %887 = vmatpush3.msra.mxu0 %v261_v5  ;;  %898 = vmatpush3.msra.mxu1 %v256_v6  ;;  %v422_v18 = vrot.slane %v254_v8, 2  ;;  %v421_v19 = vrot.slane %v1277_v7, 2  ;;  %v501_v27 = vld [vmem:[#allocation5 + $0x10] sm:$0xff]  ;;  %v500_v29 = vld [vmem:[#allocation5 + $0x8] sm:$0xff] }
  0x3b   : > { %888 = vmatprep.subr.mxu0 %v1142_v0  ;;  %899 = vmatprep.subr.mxu1 %v1142_v0  ;;  %v651_v28 = vld [vmem:[#allocation5 + $0x50] sm:$0xff]  ;;  %v650_v30 = vld [vmem:[#allocation5 + $0x48] sm:$0xff]  ;;  %v499_v31 = vld [vmem:[#allocation5] sm:$0xff]  ;;  %s735_s26 = scalar_lea.sflag [#allocation4], %s245_s10  ;;  %s1068_s30 = scalar_lea.vmem %s749_s16, 128 }
  0x3c   : > { %v269_v13 = vsel %vm266_vm1, %v267_v9, %v268_v12  ;;  %889 = vmatpush3.msra.mxu0 %v260_v10  ;;  %900 = vmatpush3.msra.mxu1 %v255_v11  ;;  %v423_v24 = vsel %vm420_vm3, %v421_v19, %v422_v18  ;;  %v649_v32 = vld [vmem:[#allocation5 + $0x40] sm:$0xff]  ;;  %p1069_p10 = scmp.ne.s32.totalorder %s749_s16, %s1068_s30  ;;  %s1144_s6 = smov [#allocation7]  }
  0x3d   : > { %891 = vmatmul.mubr.msk.f32.vlgmr.msra.gmra.mxu0 %vm270_vm2, %v269_v13  ;;  %904 = vmatprep.subr.mxu0 %v1142_v0  ;;  %v724_v44 = vld [vmem:[%s1362_s4] sm:$0xff]  ;;  %s1072_s22 = sshll.u32 %s1144_s6, 4  ;;  %s1073_s22 = int_to_ptr.vmem [resolvable:$false] %s1072_s22 }
  0x3e   : > { %915 = vmatprep.subr.mxu1 %v1142_v0  ;;  %902 = vmatmul.mubr.msk.f32.vlgmr.msra.gmra.mxu1 %vm270_vm2, %v1277_v7  ;;  %v497_v54 = vld [vmem:[%s1361_s3] sm:$0xff]  ;;  %p1070_p12 = pnand %p1069_p10, %p1213_p5  ;;  %s1074_s7 = scalar_lea.vmem %s1073_s22, 256 }
  0x3f   : > { %905 = vmatpush3.msra.mxu0 %v419_v14  ;;  %916 = vmatpush3.msra.mxu1 %v507_v15  ;;  %p1075_p11 = scmp.lt.s32.totalorder %s749_s16, %s1073_s22  ;;  %p1076_p0 = scmp.lt.s32.totalorder %s1074_s7, %s1068_s30 }
  0x40   : > { %906 = vmatprep.subr.mxu0 %v1142_v0  ;;  %917 = vmatprep.subr.mxu1 %v1142_v0  ;;  %p1071_p8 = pneg %p1070_p12 }
  0x41   : > { %907 = vmatpush3.msra.mxu0 %v418_v16  ;;  %918 = vmatpush3.msra.mxu1 %v506_v17  ;;  %p1077_p1 = por %p1076_p0, %p1075_p11 }
  0x42   : > { %908 = vmatprep.subr.mxu0 %v1142_v0  ;;  %919 = vmatprep.subr.mxu1 %v1142_v0 }
  0x43   : > { %909 = vmatpush3.msra.mxu0 %v417_v20  ;;  %920 = vmatpush3.msra.mxu1 %v505_v21  ;;  %p1078_p3 = pnand %p1077_p1, %p1071_p8 }
  0x44   : > { %910 = vmatprep.subr.mxu0 %v1142_v0  ;;  %921 = vmatprep.subr.mxu1 %v1142_v0 }
  0x45   : > { %911 = vmatpush3.msra.mxu0 %v416_v22  ;;  %912 = vmatprep.mubr.msk.f32.mxu0 %vm1143_vm0, %v1142_v0 }
  0x46   : > { %922 = vmatpush3.msra.mxu1 %v504_v23  ;;  %913 = vmatmul.mubr.msk.f32.vlgmr.msra.gmra.mxu0 %vm270_vm2, %v423_v24 }
  0x47   : > { %923 = vmatprep.mubr.msk.f32.mxu1 %vm1143_vm0, %v1142_v0  ;;  %926 = vmatprep.subr.mxu0 %v1142_v0 }
  0x48   : > { %937 = vmatprep.subr.mxu1 %v1142_v0  ;;  %924 = vmatmul.mubr.msk.f32.vlgmr.msra.gmra.mxu1 %vm270_vm2, %v269_v13 }
  0x49   : > { %927 = vmatpush3.msra.mxu0 %v502_v25  ;;  %938 = vmatpush3.msra.mxu1 %v652_v26 }
  0x4a   : > { %928 = vmatprep.subr.mxu0 %v1142_v0  ;;  %939 = vmatprep.subr.mxu1 %v1142_v0 }
  0x4b   : > { %929 = vmatpush3.msra.mxu0 %v501_v27  ;;  %940 = vmatpush3.msra.mxu1 %v651_v28 }
  0x4c   : > { %930 = vmatprep.subr.mxu0 %v1142_v0  ;;  %941 = vmatprep.subr.mxu1 %v1142_v0 }
  0x4d   : > { %931 = vmatpush3.msra.mxu0 %v500_v29  ;;  %942 = vmatpush3.msra.mxu1 %v650_v30 }
  0x4e   : > { %932 = vmatprep.subr.mxu0 %v1142_v0  ;;  %943 = vmatprep.subr.mxu1 %v1142_v0 }
  0x4f   : > { %933 = vmatpush3.msra.mxu0 %v499_v31  ;;  %934 = vmatprep.mubr.msk.f32.mxu0 %vm1143_vm0, %v1142_v0 }
  0x50   : > { %944 = vmatpush3.msra.mxu1 %v649_v32  ;;  %945 = vmatprep.mubr.msk.f32.mxu1 %vm1143_vm0, %v1142_v0 }
  0x51   : > { %935 = vmatmul.mubr.msk.f32.vlgmr.msra.gmra.mxu0 %vm270_vm2, %v1277_v7  ;;  %946 = vmatmul.mubr.msk.f32.vlgmr.msra.gmra.mxu1 %vm270_vm2, %v423_v24 }
  0xfd   : > { %v339_v33 = vpop.f32.mrf.mxu0 }
  0xfe   : > { %v411_v34 = vpop.f32.mrf.mxu1 }
  0xff   : > { %v892_v35 = vpop.f32.mrf.mxu0  ;;  %v412_v52 = vadd.f32 %v411_v34, %v339_v33 }
 0x100   : > { %v903_v36 = vpop.f32.mrf.mxu1 }
 0x106   : > { %v492_v37 = vpop.f32.mrf.mxu0 }
 0x107   : > { %v496_v53 = vadd.f32 %v492_v37, %v412_v52 }
 0x108   : > { %v574_v38 = vpop.f32.mrf.mxu1  ;;  %v914_v39 = vpop.f32.mrf.mxu0 }
 0x109   : > { %v498_v55 = vadd.f32 %v497_v54, %v496_v53 }
 0x10a   : > { %v925_v40 = vpop.f32.mrf.mxu1 }
 0x111   : > { %v644_v41 = vpop.f32.mrf.mxu0  ;;  %v719_v42 = vpop.f32.mrf.mxu1 }
 0x112   : > { %v645_v43 = vadd.f32 %v644_v41, %v574_v38 }
 0x113   : > { %v936_v45 = vpop.f32.mrf.mxu0  ;;  %v947_v46 = vpop.f32.mrf.mxu1 }
 0x114   : > { %v723_v47 = vadd.f32 %v719_v42, %v645_v43 }
 0x116   : > { %v725_v48 = vadd.f32 %v724_v44, %v723_v47 }
 0x118   : > { %v846_v49 = vmul.f32 -1.442695, %v725_v48 }
 0x11a   : > { %1012 = vpow2.f32 %v846_v49 }
 0x127   : > { %v1013_v50 = vpop.eup %1012 }
 0x128   : > { %v729_v51 = vadd.f32 1.0, %v1013_v50 }
 0x12a   : > { %1014 = vrcp.f32 %v729_v51 }
 0x137   : > { %v1015_v56 = vpop.eup %1014 }
 0x138   : > { %v732_v57 = vmul.f32 %v1015_v56, %v498_v55 }
 0x13a   : > { %733 = vst.msk [vmem:[%s247_s15] sm:$0xff] %vm270_vm2, %v732_v57 }
 0x13b   : > { %1081 = shalt.err (!%p1078_p3)
}
 0x13c   : > { %s1082_s8 = scalar_lea.hbm %s746_s25, 128  ;;  %s1086_s11 = scalar_lea.hbm %s1363_s5, 256 }
 0x13d   : > { %p1083_p2 = scmp.ne.s32.totalorder %s746_s25, %s1082_s8  ;;  %p1087_p7 = scmp.lt.s32.totalorder %s746_s25, %s1363_s5 }
 0x13e   : > { %p1088_p6 = scmp.lt.s32.totalorder %s1086_s11, %s1082_s8 }
 0x13f   : > { %p1084_p4 = pnand %p1083_p2, %p1213_p5 }
 0x140   : > { %p1089_p9 = por %p1088_p6, %p1087_p7 }
 0x141   : > { %p1085_p13 = pneg %p1084_p4 }
 0x143   : > { %p1090_p10 = pnand %p1089_p9, %p1085_p13 }
 0x145   : > { %1093 = shalt.err (!%p1090_p10)
}
 0x146   : > { %956 = dma.vmem_to_hbm [thread:$0]  (%p1213_p5), %s749_s16, 128, %s746_s25, %s735_s26  }
 0x147 PF: > { %p973_p12 = scmp.ge.s32.totalorder %s1136_s21, 2  ;;  %s760_s14 = sand.u32 1, %s1124_s18  }
 0x148   : > { %p1373_p8 = scmp.ne.s32.totalorder %s1366_s29, 0  ;;  %s761_s15 = scalar_lea.sflag [#allocation4], %s760_s14 }
 0x14a   : > { %p966_p11 = pnand %p973_p12, %p1373_p8 }
 0x14c   : > { %p967_p0 = pneg %p966_p11 }
 0x14e   : > { %1119 = dma.done.wait (%p967_p0), %s761_s15, 128  }
 0x14f   : > { %1121 = vsyncadd (%p967_p0), %s761_s15, 4294967168  ;;  %p17_p1 = scmp.ge.s32.totalorder %s1200_s24, 4   ;;  %s1374_s18 = smov %s1128_s19 }
 0x150   : > { %s1375_s19 = smov %s1132_s20  ;;  %s1376_s20 = smov %s1211_s27 }
 0x151   : > { %s1377_s21 = smov %s1200_s24  ;;  %19 = sbr.rel (!%p17_p1) target bundleno = 5 (0x5), region = 88 }
 0x156   :  { %766 = vsyncpa [#allocation3], 1 }
 0x157   :  { %768 = vsyncpa [#allocation3 + $0x1], 1 }
 0x158   :  { %769 = vsyncpa [#allocation6], 1 }
 0x159   :  { %770 = vsyncpa [#allocation4], 1 }
 0x15a   :  { %772 = vsyncpa [#allocation4 + $0x1], 1 }

</bundles_post_ra>
